<compile_context>
chip_gen: v7x
topology: tpu7x:2x2x1
jax: 0.10.0
libtpu: 0.0.40
codegen_flags: <defaults>
</compile_context>

<pallas_src>
import functools

import jax
import jax.numpy as jnp
from jax import lax
from jax.experimental import pallas as pl
from jax.experimental.pallas import tpu as pltpu

_IGNORE_INDEX = -100  # PyTorch F.cross_entropy default


def _make_loss_kernel(n_total: int, use_doc: bool, ragged: bool, subtract_max: bool):
    def kernel(x_ref, tgt_ref, o_ref):
        pid = pl.program_id(0)

        x = x_ref[...].astype(jnp.float32)   # [T, C]
        tgt = tgt_ref[...]                   # [T, 1] int32
        t, c = x.shape

        if ragged:
            # Only the last tile can be ragged; mask rows past N (block padding).
            row_ids = pid * t + lax.broadcasted_iota(jnp.int32, (t, 1), 0)  # [T, 1]
            in_range = row_ids < n_total                                    # [T, 1]
            # Sanitize padded rows so exp/log never see garbage.
            x = jnp.where(in_range, x, 0.0)
            valid = jnp.logical_and(in_range, tgt != _IGNORE_INDEX)         # [T, 1]
        else:
            valid = tgt != _IGNORE_INDEX                                    # [T, 1]

        # One-hot rebuilt in-kernel: col == target (pure VPU work, no HBM one-hot).
        col_ids = lax.broadcasted_iota(jnp.int32, (t, c), 1)                # [T, C]
        onehot = col_ids == tgt                                             # [T, C]
        picked = jnp.sum(jnp.where(onehot, x, 0.0), axis=1, keepdims=True)  # [T, 1]

        # ---- softmax cross entropy ----
        if subtract_max:
            row_max = jnp.max(x, axis=1, keepdims=True)                     # [T, 1]
            lse = jnp.log(jnp.sum(jnp.exp(x - row_max), axis=1,
                                  keepdims=True)) + row_max                 # [T, 1]
        else:
            # Inputs known to be in (0,1): exp cannot overflow; skip the max pass.
            lse = jnp.log(jnp.sum(jnp.exp(x), axis=1, keepdims=True))       # [T, 1]

        ce_rows = jnp.where(valid, lse - picked, 0.0)                       # [T, 1]
        ce_sum = jnp.sum(ce_rows)
        cnt_sum = jnp.sum(valid.astype(jnp.float32))

        if use_doc:
            # ---- binary cross entropy vs one-hot, treating x as probabilities ----
            # PyTorch clamps each log term at -100.  Exploit one-hot structure:
            #   row_sum = -sum_c log(1-x_c) + [log(1-x_p) - log(x_p)]  (only if valid)
            # => only one transcendental per element plus O(T) per-row scalars.
            log1mx = jnp.maximum(jnp.log(1.0 - x), -100.0)                  # [T, C]
            log_px = jnp.maximum(jnp.log(picked), -100.0)                   # [T, 1]
            log1m_px = jnp.maximum(jnp.log(1.0 - picked), -100.0)           # [T, 1]
            corr = jnp.where(valid, log1m_px - log_px, 0.0)                 # [T, 1]
            bce_rows = -jnp.sum(log1mx, axis=1, keepdims=True) + corr       # [T, 1]
            if ragged:
                bce_rows = jnp.where(in_range, bce_rows, 0.0)
            bce_sum = jnp.sum(bce_rows)
        else:
            bce_sum = jnp.float32(0.0)

        # Lane-dense per-tile partials: lanes 0/1/2 of sublane 0 carry
        # (ce_sum, valid_count, bce_sum); rest zero.  Final reduce in wrapper.
        sub = lax.broadcasted_iota(jnp.int32, (8, 128), 0)
        lane = lax.broadcasted_iota(jnp.int32, (8, 128), 1)
        blk = jnp.where(jnp.logical_and(sub == 0, lane == 0), ce_sum, 0.0)
        blk = jnp.where(jnp.logical_and(sub == 0, lane == 1), cnt_sum, blk)
        blk = jnp.where(jnp.logical_and(sub == 0, lane == 2), bce_sum, blk)
        o_ref[...] = blk.reshape(1, 8, 128)

    return kernel


def _tile_and_vmem(n: int, c: int) -> tuple[int, int]:
    """Per-generation row-tile size + scoped-VMEM limit.

    The tile budget is expressed in f32-element terms of one [T, C_lane_padded]
    slab, so it simultaneously bounds the (possibly narrower-dtype) input block
    and each of the ~3-4 f32 intermediates the kernel materializes.
    """
    try:
        vmem_cap = int(pltpu.get_tpu_info().vmem_capacity_bytes)
    except Exception:
        vmem_cap = 64 * 1024 * 1024  # conservative (v7x-sized) fallback
    if vmem_cap >= 96 * 1024 * 1024:        # v5e / v6e (128 MiB VMEM)
        block_budget = 8 * 1024 * 1024      # per [T, C] f32 slab
        vmem_limit = 96 * 1024 * 1024
    else:                                    # v7x (64 MiB VMEM per TC)
        block_budget = 6 * 1024 * 1024
        vmem_limit = 48 * 1024 * 1024

    c_pad = max(128, ((c + 127) // 128) * 128)   # lane padding in VMEM
    rows = block_budget // (c_pad * 4)
    rows = max(8, (rows // 8) * 8)               # multiple of 8 sublanes, no upper cap
    if n <= rows:
        return n, vmem_limit
    return rows, vmem_limit


@functools.partial(jax.jit,
                   static_argnames=("use_doc", "tile_n", "assume_unit_interval"))
def cross_entropy_loss(logits, target, use_doc: bool = False, tile_n=None,
                       assume_unit_interval=None):
    """logits: [N, C] float (f32 or bf16), target: [N] int -> scalar float32 loss."""
    n, c = logits.shape
    if assume_unit_interval is None:
        # binary_cross_entropy requires inputs in (0,1); CE-only path may be raw logits.
        assume_unit_interval = bool(use_doc)

    auto_tile, vmem_limit = _tile_and_vmem(n, c)
    if tile_n is None:
        tile_n = auto_tile
    tile_n = min(int(tile_n), n)
    if tile_n != n and tile_n % 8 != 0:
        tile_n = max(8, (tile_n // 8) * 8)

    num_tiles = pl.cdiv(n, tile_n)
    ragged = (n % tile_n) != 0
    target2d = target.astype(jnp.int32).reshape(n, 1)

    partials = pl.pallas_call(
        _make_loss_kernel(n, use_doc, ragged, not assume_unit_interval),
        out_shape=jax.ShapeDtypeStruct((num_tiles, 8, 128), jnp.float32),
        grid_spec=pltpu.PrefetchScalarGridSpec(
            num_scalar_prefetch=0,
            grid=(num_tiles,),
            in_specs=[
                pl.BlockSpec((tile_n, c), lambda i: (i, 0)),   # logits tile
                pl.BlockSpec((tile_n, 1), lambda i: (i, 0)),   # int32 targets
            ],
            out_specs=pl.BlockSpec((1, 8, 128), lambda i: (i, 0, 0)),
        ),
        compiler_params=pltpu.CompilerParams(
            dimension_semantics=("parallel",),   # independent tiles: both TCs on v7x
            vmem_limit_bytes=vmem_limit,
        ),
    )(logits, target2d)

    sums = jnp.sum(partials, axis=(0, 1))            # [128]
    loss = sums[0] / sums[1]                          # CE sum / valid-row count
    if use_doc:
        loss = loss + sums[2] / jnp.float32(n * c)    # BCE mean over N*C
    return loss


def _reference_loss(logits, target, use_doc: bool):
    """Pure-JAX reference matching torch semantics (sanity check)."""
    logits = logits.astype(jnp.float32)
    n, c = logits.shape
    valid = target != _IGNORE_INDEX
    one_hot = jax.nn.one_hot(target, c, dtype=jnp.float32)   # -100 -> all-zeros row
    lse = jax.scipy.special.logsumexp(logits, axis=1)
    ce_rows = lse - jnp.sum(logits * one_hot, axis=1)
    ce = jnp.sum(jnp.where(valid, ce_rows, 0.0)) / jnp.sum(valid.astype(jnp.float32))
    loss = ce
    if use_doc:
        log_x = jnp.maximum(jnp.log(logits), -100.0)
        log_1mx = jnp.maximum(jnp.log(1.0 - logits), -100.0)
        loss = loss + jnp.mean(-(one_hot * log_x + (1.0 - one_hot) * log_1mx))
    return loss


if __name__ == "__main__":
    key = jax.random.PRNGKey(0)
    k1, k2, k3, k4, k5, k6 = jax.random.split(key, 6)

    # The module feeds the same tensor to cross_entropy (as logits) and
    # binary_cross_entropy (as probabilities), so keep values in (0, 1) so the
    # use_doc path is numerically valid (same precondition as the PyTorch module).

    # Case 1: single-tile path.
    n1, c1 = 8, 32
    x1 = jax.nn.sigmoid(jax.random.normal(k1, (n1, c1), dtype=jnp.float32))
    t1 = jax.random.randint(k2, (n1,), 0, c1, dtype=jnp.int32)

    # Case 2: multi-tile path with a ragged last tile (forces grid + masking).
    n2, c2 = 20, 128
    x2 = jax.nn.sigmoid(jax.random.normal(k3, (n2, c2), dtype=jnp.float32))
    t2 = jax.random.randint(k4, (n2,), 0, c2, dtype=jnp.int32)

    # Case 3: includes ignore_index rows (covers the fixed use_doc + ignore bug).
    n3, c3 = 16, 64
    x3 = jax.nn.sigmoid(jax.random.normal(k5, (n3, c3), dtype=jnp.float32))
    t3 = jax.random.randint(k6, (n3,), 0, c3, dtype=jnp.int32)
    t3 = t3.at[3].set(_IGNORE_INDEX).at[10].set(_IGNORE_INDEX)

    for (x, t, tile) in ((x1, t1, None), (x2, t2, 8), (x3, t3, 8)):
        for use_doc in (False, True):
            got = jax.block_until_ready(
                cross_entropy_loss(x, t, use_doc=use_doc, tile_n=tile))
            want = _reference_loss(x, t, use_doc)
            assert jnp.allclose(got, want, rtol=1e-4, atol=1e-4), \
                (use_doc, tile, got, want)

    print("KERNEL_OK")
</pallas_src>

<mosaic_0001>
module attributes {stable_mosaic.version = 11 : i64} {
  func.func @kernel(%arg0: i32, %arg1: memref<8x32xf32, #tpu.memory_space<vmem>>, %arg2: memref<8x1xi32, #tpu.memory_space<vmem>>, %arg3: memref<1x8x128xf32, #tpu.memory_space<vmem>>) attributes {dimension_semantics = [#tpu.dimension_semantics<parallel>], iteration_bounds = array<i64: 1>, scalar_prefetch = 0 : i64, scratch_operands = 0 : i64, tpu.core_type = #tpu.core_type<tc>, window_params = [{transform_indices = @transform_0, window_bounds = array<i64: 8, 32>}, {transform_indices = @transform_1, window_bounds = array<i64: 8, 1>}, {transform_indices = @transform_2, window_bounds = array<i64: 1, 8, 128>}]} {
    %c0 = arith.constant 0 : index
    %c0_0 = arith.constant 0 : index
    %0 = vector.load %arg1[%c0, %c0_0] : memref<8x32xf32, #tpu.memory_space<vmem>>, vector<8x32xf32>
    %c0_1 = arith.constant 0 : index
    %c0_2 = arith.constant 0 : index
    %1 = vector.load %arg2[%c0_1, %c0_2] : memref<8x1xi32, #tpu.memory_space<vmem>>, vector<8x1xi32>
    %c-100_i32 = arith.constant -100 : i32
    %2 = vector.broadcast %c-100_i32 : i32 to vector<8x1xi32>
    %3 = arith.cmpi ne, %1, %2 : vector<8x1xi32>
    %4 = tpu.iota {dimensions = array<i32: 1>} : vector<8x32xi32>
    %5 = vector.broadcast %1 : vector<8x1xi32> to vector<8x32xi32>
    %6 = arith.cmpi eq, %4, %5 : vector<8x32xi32>
    %cst = arith.constant 0.000000e+00 : f32
    %7 = vector.broadcast %cst : f32 to vector<8x32xf32>
    %8 = arith.select %6, %0, %7 : vector<8x32xi1>, vector<8x32xf32>
    %cst_3 = arith.constant dense<0.000000e+00> : vector<8xf32>
    %9 = vector.multi_reduction <add>, %8, %cst_3 [1] : vector<8x32xf32> to vector<8xf32>
    %10 = vector.shape_cast %9 : vector<8xf32> to vector<8x1xf32>
    %cst_4 = arith.constant dense<0xFF800000> : vector<8xf32>
    %11 = vector.multi_reduction <maximumf>, %0, %cst_4 [1] : vector<8x32xf32> to vector<8xf32>
    %12 = vector.shape_cast %11 : vector<8xf32> to vector<8x1xf32>
    %13 = vector.broadcast %12 : vector<8x1xf32> to vector<8x32xf32>
    %14 = arith.subf %0, %13 : vector<8x32xf32>
    %15 = math.exp %14 : vector<8x32xf32>
    %cst_5 = arith.constant dense<0.000000e+00> : vector<8xf32>
    %16 = vector.multi_reduction <add>, %15, %cst_5 [1] : vector<8x32xf32> to vector<8xf32>
    %17 = vector.shape_cast %16 : vector<8xf32> to vector<8x1xf32>
    %18 = math.log %17 : vector<8x1xf32>
    %19 = arith.addf %18, %12 : vector<8x1xf32>
    %20 = arith.subf %19, %10 : vector<8x1xf32>
    %cst_6 = arith.constant 0.000000e+00 : f32
    %21 = vector.broadcast %cst_6 : f32 to vector<8x1xf32>
    %22 = arith.select %3, %20, %21 : vector<8x1xi1>, vector<8x1xf32>
    %23 = vector.shape_cast %22 : vector<8x1xf32> to vector<1x8x1xf32>
    %cst_7 = arith.constant dense<0.000000e+00> : vector<1xf32>
    %24 = vector.multi_reduction <add>, %23, %cst_7 [1, 2] : vector<1x8x1xf32> to vector<1xf32>
    %25 = vector.shape_cast %24 : vector<1xf32> to vector<1x1x1xf32>
    %26 = vector.extract %25[0, 0, 0] : f32 from vector<1x1x1xf32>
    %27 = arith.extui %3 : vector<8x1xi1> to vector<8x1xi32>
    %28 = arith.sitofp %27 : vector<8x1xi32> to vector<8x1xf32>
    %29 = vector.shape_cast %28 : vector<8x1xf32> to vector<1x8x1xf32>
    %cst_8 = arith.constant dense<0.000000e+00> : vector<1xf32>
    %30 = vector.multi_reduction <add>, %29, %cst_8 [1, 2] : vector<1x8x1xf32> to vector<1xf32>
    %31 = vector.shape_cast %30 : vector<1xf32> to vector<1x1x1xf32>
    %32 = vector.extract %31[0, 0, 0] : f32 from vector<1x1x1xf32>
    %33 = tpu.iota {dimensions = array<i32: 0>} : vector<8x128xi32>
    %34 = tpu.iota {dimensions = array<i32: 1>} : vector<8x128xi32>
    %c0_i32 = arith.constant 0 : i32
    %35 = vector.broadcast %c0_i32 : i32 to vector<8x128xi32>
    %36 = arith.cmpi eq, %33, %35 : vector<8x128xi32>
    %c0_i32_9 = arith.constant 0 : i32
    %37 = vector.broadcast %c0_i32_9 : i32 to vector<8x128xi32>
    %38 = arith.cmpi eq, %34, %37 : vector<8x128xi32>
    %39 = arith.andi %36, %38 : vector<8x128xi1>
    %cst_10 = arith.constant 0.000000e+00 : f32
    %40 = vector.broadcast %26 : f32 to vector<8x128xf32>
    %41 = vector.broadcast %cst_10 : f32 to vector<8x128xf32>
    %42 = arith.select %39, %40, %41 : vector<8x128xi1>, vector<8x128xf32>
    %c0_i32_11 = arith.constant 0 : i32
    %43 = vector.broadcast %c0_i32_11 : i32 to vector<8x128xi32>
    %44 = arith.cmpi eq, %33, %43 : vector<8x128xi32>
    %c1_i32 = arith.constant 1 : i32
    %45 = vector.broadcast %c1_i32 : i32 to vector<8x128xi32>
    %46 = arith.cmpi eq, %34, %45 : vector<8x128xi32>
    %47 = arith.andi %44, %46 : vector<8x128xi1>
    %48 = vector.broadcast %32 : f32 to vector<8x128xf32>
    %49 = arith.select %47, %48, %42 : vector<8x128xi1>, vector<8x128xf32>
    %c0_i32_12 = arith.constant 0 : i32
    %50 = vector.broadcast %c0_i32_12 : i32 to vector<8x128xi32>
    %51 = arith.cmpi eq, %33, %50 : vector<8x128xi32>
    %c2_i32 = arith.constant 2 : i32
    %52 = vector.broadcast %c2_i32 : i32 to vector<8x128xi32>
    %53 = arith.cmpi eq, %34, %52 : vector<8x128xi32>
    %54 = arith.andi %51, %53 : vector<8x128xi1>
    %cst_13 = arith.constant 0.000000e+00 : f32
    %55 = vector.broadcast %cst_13 : f32 to vector<8x128xf32>
    %56 = arith.select %54, %55, %49 : vector<8x128xi1>, vector<8x128xf32>
    %57 = vector.shape_cast %56 : vector<8x128xf32> to vector<1x8x128xf32>
    %c0_14 = arith.constant 0 : index
    %c0_15 = arith.constant 0 : index
    %c0_16 = arith.constant 0 : index
    %58 = vector.load %arg3[%c0_14, %c0_15, %c0_16] : memref<1x8x128xf32, #tpu.memory_space<vmem>>, vector<1x8x128xf32>
    tpu.vector_store %arg3[%c0_14, %c0_15, %c0_16], %57 {strides = array<i32>} : memref<1x8x128xf32, #tpu.memory_space<vmem>>, vector<1x8x128xf32>,
    return
  }
  func.func @transform_0(%arg0: i32) -> (i32, i32) {
    %c0_i32 = arith.constant 0 : i32
    %c0_i32_0 = arith.constant 0 : i32
    return %arg0, %c0_i32 : i32, i32
  }
  func.func @transform_1(%arg0: i32) -> (i32, i32) {
    %c0_i32 = arith.constant 0 : i32
    %c0_i32_0 = arith.constant 0 : i32
    return %arg0, %c0_i32 : i32, i32
  }
  func.func @transform_2(%arg0: i32) -> (i32, i32, i32) {
    %c0_i32 = arith.constant 0 : i32
    %c0_i32_0 = arith.constant 0 : i32
    %c0_i32_1 = arith.constant 0 : i32
    return %arg0, %c0_i32, %c0_i32_0 : i32, i32, i32
  }
}

</mosaic_0001>

<bundles_post_ra>
// kernel: cross_entropy_loss.1
= control target key start
LH: loop header
LB: loop body
LE: loop exit
PB: predicated region body
PF: predicated region fallthrough
CT: control target
= control target key end

     0   :  { %vm21_vm0 = vcmask 261120   ;;  %v93_v1 = vmov 0   ;;  %v14_v7 = vlaneseq  ;;  %vm39_vm3 = vcmask 7168   ;;  %s122_s0 = inlined_call_operand.vmem [shape: f32[8,32], index: 0, kind: input, shape index: {}]   ;;  %s123_s1 = inlined_call_operand.vmem [shape: s32[8,1], index: 1, kind: input, shape index: {}]   ;;  %s124_s2 = inlined_call_operand.vmem [shape: f32[1,8,128], index: 2, kind: output, shape index: {}]  }
   0x1   :  { %v11_v0 = vld [vmem:[%s122_s0] sm:$0xff]  ;;  %88 = vset.pattern.permute.xlu0 %v93_v1  ;;  %v94_v21 = vmov 0.0  }
   0x2   :  { %v25_v2 = vsel %vm21_vm0, %v11_v0, -inf  ;;  %v12_v3 = vld [vmem:[%s123_s1] sm:$0xff]  ;;  %v15_v8 = vand.u32 127, %v14_v7  ;;  %v63_v39 = vshrl.u32 %v14_v7, 7 }
   0x3   :  { %26 = vmax.xlane.f32.xlu0 %v25_v2  ;;  %vm13_vm2 = vcmp.ne.s32.totalorder %v12_v3, 4294967196 }
   0x4   :  { %v81_v22 = vsel %vm13_vm2, 1.0, %v94_v21  ;;  %vm64_vm4 = vcmp.eq.s32.totalorder %v63_v39, 0  ;;  %vm65_vm5 = vcmp.eq.s32.totalorder %v15_v8, 0  ;;  %vm69_vm6 = vcmp.eq.s32.totalorder %v15_v8, 1 }
   0x5   :  { %v52_v24 = vsel %vm39_vm3, %v81_v22, 0.0  ;;  %vm73_vm7 = vcmp.eq.s32.totalorder %v15_v8, 2  ;;  %vm66_vm8 = vmand %vm64_vm4, %vm65_vm5 }
   0x6   :  { %vm70_vm9 = vmand %vm64_vm4, %vm69_vm6 }
   0x7   :  { %vm74_vm10 = vmand %vm64_vm4, %vm73_vm7 }
  0x19   :  { %17 = vperm.xlu0 %88, %v12_v3  }
  0x90   :  { %v27_v4 = vpop.xlane.xlu0 %26 }
  0x91   :  { %v28_v5 = vsub.f32 %v11_v0, %v27_v4 }
  0x93   :  { %v29_v6 = vmul.f32 1.442695, %v28_v5 }
  0x95   :  { %89 = vpow2.f32 %v29_v6 }
  0x98   :  { %v18_v9 = vpop.permute.xlu0 %17 }
  0x99   :  { %vm19_vm1 = vcmp.eq.s32.totalorder %v15_v8, %v18_v9 }
  0x9a   :  { %v20_v11 = vsel %vm19_vm1, %v11_v0, 0.0 }
  0x9b   :  { %v22_v13 = vsel %vm21_vm0, %v20_v11, 0.0 }
  0x9f   :  { %v90_v10 = vpop.eup %89 }
  0xa0   :  { %v31_v12 = vsel %vm21_vm0, %v90_v10, 0.0 }
  0xa1   :  { %32 = vadd.xlane.f32.xlu1 %v31_v12 }
  0xa5   :  { %23 = vadd.xlane.f32.xlu1 %v22_v13 }
 0x12e   :  { %v33_v14 = vpop.xlane.xlu1 %32 }
 0x12f   :  { %91 = vlog2.f32 %v33_v14 }
 0x132   :  { %v24_v17 = vpop.xlane.xlu1 %23 }
 0x139   :  { %v92_v15 = vpop.eup %91 }
 0x13a   :  { %v35_v16 = vmul.f32 0.6931472, %v92_v15 }
 0x13c   :  { %v36_v18 = vadd.f32 %v35_v16, %v27_v4 }
 0x13e   :  { %v37_v19 = vsub.f32 %v36_v18, %v24_v17 }
 0x140   :  { %v38_v20 = vsel %vm13_vm2, %v37_v19, 0.0 }
 0x141   :  { %v40_v23 = vsel %vm39_vm3, %v38_v20, 0.0 }
 0x142   :  { %41 = vadd.xlane.f32.xlu1 %v40_v23 }
 0x146   :  { %53 = vadd.xlane.f32.xlu1 %v52_v24 }
 0x1cf   :  { %v42_v25 = vpop.xlane.xlu1 %41 }
 0x1d0   :  { %v43_v26 = vrot.slane %v42_v25, 4 }
 0x1d2   :  { %v44_v27 = vadd.f32 %v43_v26, %v42_v25 }
 0x1d3   :  { %v54_v28 = vpop.xlane.xlu1 %53 }
 0x1d4   :  { %v45_v29 = vrot.slane %v44_v27, 2  ;;  %v55_v30 = vrot.slane %v54_v28, 4 }
 0x1d6   :  { %v56_v31 = vadd.f32 %v55_v30, %v54_v28  ;;  %v46_v32 = vadd.f32 %v45_v29, %v44_v27 }
 0x1d8   :  { %v57_v33 = vrot.slane %v56_v31, 2  ;;  %v47_v34 = vrot.slane %v46_v32, 1 }
 0x1da   :  { %v58_v35 = vadd.f32 %v57_v33, %v56_v31  ;;  %v48_v36 = vadd.f32 %v47_v34, %v46_v32 }
 0x1dc   :  { %82 = vpush %v48_v36  ;;  %v59_v37 = vrot.slane %v58_v35, 1 }
 0x1de   :  { %v60_v38 = vadd.f32 %v59_v37, %v58_v35 }
 0x1e0   :  { %84 = vpush %v60_v38 }
 0x20d   :  { %s83_s0 = spop %82 }
 0x20e   :  { %v67_v40 = vstv %s83_s0 }
 0x20f   :  { %v68_v41 = vsel %vm66_vm8, %v67_v40, 0.0 }
 0x211   :  { %s85_s1 = spop %84 }
 0x212   :  { %v71_v42 = vstv %s85_s1 }
 0x213   :  { %v72_v43 = vsel %vm70_vm9, %v71_v42, %v68_v41 }
 0x214   :  { %v75_v44 = vsel %vm74_vm10, 0.0, %v72_v43 }
 0x215   :  { %76 = vst [vmem:[%s124_s2] sm:$0xff] %v75_v44 }

</bundles_post_ra>
